<compile_context>
chip_gen: v7x
topology: tpu7x:2x2x1
jax: 0.10.0
libtpu: 0.0.40
codegen_flags: <defaults>
</compile_context>

<pallas_src>
import functools

import jax
import jax.numpy as jnp
from jax.experimental import pallas as pl
from jax.experimental.pallas import tpu as pltpu


def _reorg_kernel(x_ref, o_ref, *, stride, nH, nW):
    # x_ref : (c_blk, H, W)          one channel block (H, W are the full spatial dims)
    # o_ref : (c_blk, s*s, nH, nW)   matching output block; channel slot = sh*s + sw
    s = stride
    for sh in range(s):
        # Sublane (H) de-interleave: pick rows i*s + sh with plain integer-indexed
        # reads of the ref (unit stride only -- no strided pl.ds).
        rows = jnp.stack(
            [x_ref[:, i * s + sh, :] for i in range(nH)], axis=1)          # (c_blk, nH, W)
        for sw in range(s):
            # Lane (W) de-interleave: pick columns j*s + sw with unit-stride
            # slices + one concatenate (exact copy semantics, no MXU).
            piece = jnp.concatenate(
                [rows[:, :, j * s + sw: j * s + sw + 1] for j in range(nW)],
                axis=2)                                                     # (c_blk, nH, nW)
            # Direct store into the output channel slot (no stack/transpose/reshape).
            o_ref[:, sh * s + sw, :, :] = piece
    # TODO(synk): A/B a lane-dense output layout ((c_blk*s*s, nH*nW) flat) -- it needs
    # an in-kernel sublane->lane relayout; keep masked nW-wide stores for robustness.


def _round_up(x, m):
    return (x + m - 1) // m * m


def reorg_pallas(x, stride=2, *, block_bytes=4 * 1024 * 1024, min_steps=4):
    B, C, H, W = x.shape
    s = stride
    assert H % s == 0 and W % s == 0, "Height and width should be divisible by stride."
    nH, nW = H // s, W // s
    BC = B * C

    itemsize = jnp.dtype(x.dtype).itemsize
    sublane = max(8, 32 // itemsize)            # f32 -> 8, bf16 -> 16, int8 -> 32

    # Padded VMEM bytes per input channel for one (input + output) block copy.
    in_ch = _round_up(H, sublane) * _round_up(W, 128) * itemsize
    out_ch = s * s * _round_up(nH, sublane) * _round_up(nW, 128) * itemsize
    per_ch = in_ch + out_ch

    # Largest channel block (divisor of B*C) whose padded footprint fits the budget,
    # preferring >= min_steps grid steps so prefetch/writeback overlap and v7x's two
    # TensorCores have work to split.
    divisors = [d for d in range(1, BC + 1) if BC % d == 0]
    want_steps = min(min_steps, BC)
    cands = [d for d in divisors if d * per_ch <= block_bytes and BC // d >= want_steps]
    if not cands:
        cands = [d for d in divisors if d * per_ch <= block_bytes] or [1]
    c_blk = max(cands)
    grid = (BC // c_blk,)

    # Double-buffered in+out blocks (padded) plus generous headroom for relayouts.
    vmem_need = 2 * c_blk * per_ch
    vmem_limit = int(min(max(2 * vmem_need, 32 * 1024 * 1024), 64 * 1024 * 1024))

    xf = x.reshape(BC, H, W)                    # free reshape: fold batch into channels
    kernel = functools.partial(_reorg_kernel, stride=s, nH=nH, nW=nW)
    yf = pl.pallas_call(
        kernel,
        out_shape=jax.ShapeDtypeStruct((BC, s * s, nH, nW), x.dtype),
        grid=grid,
        in_specs=[pl.BlockSpec((c_blk, H, W), lambda g: (g, 0, 0))],
        out_specs=pl.BlockSpec((c_blk, s * s, nH, nW), lambda g: (g, 0, 0, 0)),
        compiler_params=pltpu.CompilerParams(
            dimension_semantics=("parallel",),
            vmem_limit_bytes=vmem_limit,
        ),
    )(xf)
    # Free reshape back to the PyTorch ReorgLayer output layout.
    return yf.reshape(B, C * s * s, nH, nW)


def reorg_ref(x, stride=2):
    # Pure-JAX reference mirroring the PyTorch view/permute/view exactly.
    B, C, H, W = x.shape
    s = stride
    nH, nW = H // s, W // s
    y = x.reshape(B, C, nH, s, nW, s)
    y = jnp.transpose(y, (0, 1, 3, 5, 2, 4))
    return y.reshape(B, C * s * s, nH, nW)


if __name__ == "__main__":
    key = jax.random.PRNGKey(0)
    x = jax.random.normal(key, (2, 4, 16, 16), dtype=jnp.float32)

    y = reorg_pallas(x, stride=2)
    jax.block_until_ready(y)

    y_ref = reorg_ref(x, stride=2)
    assert y.shape == (2, 16, 8, 8), y.shape
    assert y.dtype == x.dtype
    assert bool(jnp.array_equal(y, y_ref)), "Pallas reorg mismatch vs reference"

    print("KERNEL_OK")
</pallas_src>

<mosaic_0001>
module attributes {stable_mosaic.version = 11 : i64} {
  func.func @_reorg_kernel(%arg0: i32, %arg1: memref<2x16x16xf32, #tpu.memory_space<vmem>>, %arg2: memref<2x4x8x8xf32, #tpu.memory_space<vmem>>) attributes {dimension_semantics = [#tpu.dimension_semantics<parallel>], iteration_bounds = array<i64: 4>, scalar_prefetch = 0 : i64, scratch_operands = 0 : i64, tpu.core_type = #tpu.core_type<tc>, window_params = [{transform_indices = @transform_0, window_bounds = array<i64: 2, 16, 16>}, {transform_indices = @transform_1, window_bounds = array<i64: 2, 4, 8, 8>}]} {
    %c0 = arith.constant 0 : index
    %c0_0 = arith.constant 0 : index
    %c0_1 = arith.constant 0 : index
    %0 = vector.load %arg1[%c0, %c0_0, %c0_1] : memref<2x16x16xf32, #tpu.memory_space<vmem>>, vector<2x1x16xf32>
    %1 = vector.shape_cast %0 : vector<2x1x16xf32> to vector<2x16xf32>
    %c0_2 = arith.constant 0 : index
    %c2 = arith.constant 2 : index
    %c0_3 = arith.constant 0 : index
    %2 = vector.load %arg1[%c0_2, %c2, %c0_3] : memref<2x16x16xf32, #tpu.memory_space<vmem>>, vector<2x1x16xf32>
    %3 = vector.shape_cast %2 : vector<2x1x16xf32> to vector<2x16xf32>
    %c0_4 = arith.constant 0 : index
    %c4 = arith.constant 4 : index
    %c0_5 = arith.constant 0 : index
    %4 = vector.load %arg1[%c0_4, %c4, %c0_5] : memref<2x16x16xf32, #tpu.memory_space<vmem>>, vector<2x1x16xf32>
    %5 = vector.shape_cast %4 : vector<2x1x16xf32> to vector<2x16xf32>
    %c0_6 = arith.constant 0 : index
    %c6 = arith.constant 6 : index
    %c0_7 = arith.constant 0 : index
    %6 = vector.load %arg1[%c0_6, %c6, %c0_7] : memref<2x16x16xf32, #tpu.memory_space<vmem>>, vector<2x1x16xf32>
    %7 = vector.shape_cast %6 : vector<2x1x16xf32> to vector<2x16xf32>
    %c0_8 = arith.constant 0 : index
    %c8 = arith.constant 8 : index
    %c0_9 = arith.constant 0 : index
    %8 = vector.load %arg1[%c0_8, %c8, %c0_9] : memref<2x16x16xf32, #tpu.memory_space<vmem>>, vector<2x1x16xf32>
    %9 = vector.shape_cast %8 : vector<2x1x16xf32> to vector<2x16xf32>
    %c0_10 = arith.constant 0 : index
    %c10 = arith.constant 10 : index
    %c0_11 = arith.constant 0 : index
    %10 = vector.load %arg1[%c0_10, %c10, %c0_11] : memref<2x16x16xf32, #tpu.memory_space<vmem>>, vector<2x1x16xf32>
    %11 = vector.shape_cast %10 : vector<2x1x16xf32> to vector<2x16xf32>
    %c0_12 = arith.constant 0 : index
    %c12 = arith.constant 12 : index
    %c0_13 = arith.constant 0 : index
    %12 = vector.load %arg1[%c0_12, %c12, %c0_13] : memref<2x16x16xf32, #tpu.memory_space<vmem>>, vector<2x1x16xf32>
    %13 = vector.shape_cast %12 : vector<2x1x16xf32> to vector<2x16xf32>
    %c0_14 = arith.constant 0 : index
    %c14 = arith.constant 14 : index
    %c0_15 = arith.constant 0 : index
    %14 = vector.load %arg1[%c0_14, %c14, %c0_15] : memref<2x16x16xf32, #tpu.memory_space<vmem>>, vector<2x1x16xf32>
    %15 = vector.shape_cast %14 : vector<2x1x16xf32> to vector<2x16xf32>
    %16 = vector.shape_cast %1 : vector<2x16xf32> to vector<2x1x16xf32>
    %17 = vector.shape_cast %3 : vector<2x16xf32> to vector<2x1x16xf32>
    %18 = vector.shape_cast %5 : vector<2x16xf32> to vector<2x1x16xf32>
    %19 = vector.shape_cast %7 : vector<2x16xf32> to vector<2x1x16xf32>
    %20 = vector.shape_cast %9 : vector<2x16xf32> to vector<2x1x16xf32>
    %21 = vector.shape_cast %11 : vector<2x16xf32> to vector<2x1x16xf32>
    %22 = vector.shape_cast %13 : vector<2x16xf32> to vector<2x1x16xf32>
    %23 = vector.shape_cast %15 : vector<2x16xf32> to vector<2x1x16xf32>
    %24 = tpu.concatenate %16, %17, %18, %19, %20, %21, %22, %23 in 1 : vector<2x1x16xf32>, vector<2x1x16xf32>, vector<2x1x16xf32>, vector<2x1x16xf32>, vector<2x1x16xf32>, vector<2x1x16xf32>, vector<2x1x16xf32>, vector<2x1x16xf32> -> vector<2x8x16xf32>
    %25 = vector.extract_strided_slice %24 {offsets = [0, 0, 0], sizes = [2, 8, 1], strides = [1, 1, 1]} : vector<2x8x16xf32> to vector<2x8x1xf32>
    %26 = vector.extract_strided_slice %24 {offsets = [0, 0, 2], sizes = [2, 8, 1], strides = [1, 1, 1]} : vector<2x8x16xf32> to vector<2x8x1xf32>
    %27 = vector.extract_strided_slice %24 {offsets = [0, 0, 4], sizes = [2, 8, 1], strides = [1, 1, 1]} : vector<2x8x16xf32> to vector<2x8x1xf32>
    %28 = vector.extract_strided_slice %24 {offsets = [0, 0, 6], sizes = [2, 8, 1], strides = [1, 1, 1]} : vector<2x8x16xf32> to vector<2x8x1xf32>
    %29 = vector.extract_strided_slice %24 {offsets = [0, 0, 8], sizes = [2, 8, 1], strides = [1, 1, 1]} : vector<2x8x16xf32> to vector<2x8x1xf32>
    %30 = vector.extract_strided_slice %24 {offsets = [0, 0, 10], sizes = [2, 8, 1], strides = [1, 1, 1]} : vector<2x8x16xf32> to vector<2x8x1xf32>
    %31 = vector.extract_strided_slice %24 {offsets = [0, 0, 12], sizes = [2, 8, 1], strides = [1, 1, 1]} : vector<2x8x16xf32> to vector<2x8x1xf32>
    %32 = vector.extract_strided_slice %24 {offsets = [0, 0, 14], sizes = [2, 8, 1], strides = [1, 1, 1]} : vector<2x8x16xf32> to vector<2x8x1xf32>
    %33 = tpu.concatenate %25, %26, %27, %28, %29, %30, %31, %32 in 2 : vector<2x8x1xf32>, vector<2x8x1xf32>, vector<2x8x1xf32>, vector<2x8x1xf32>, vector<2x8x1xf32>, vector<2x8x1xf32>, vector<2x8x1xf32>, vector<2x8x1xf32> -> vector<2x8x8xf32>
    %c0_16 = arith.constant 0 : index
    %c0_17 = arith.constant 0 : index
    %c0_18 = arith.constant 0 : index
    %c0_19 = arith.constant 0 : index
    %34 = vector.load %arg2[%c0_16, %c0_17, %c0_18, %c0_19] : memref<2x4x8x8xf32, #tpu.memory_space<vmem>>, vector<2x1x8x8xf32>
    %35 = vector.shape_cast %34 : vector<2x1x8x8xf32> to vector<2x8x8xf32>
    %36 = vector.shape_cast %33 : vector<2x8x8xf32> to vector<2x1x8x8xf32>
    tpu.vector_store %arg2[%c0_16, %c0_17, %c0_18, %c0_19], %36 {strides = array<i32>} : memref<2x4x8x8xf32, #tpu.memory_space<vmem>>, vector<2x1x8x8xf32>,
    %37 = vector.extract_strided_slice %24 {offsets = [0, 0, 1], sizes = [2, 8, 1], strides = [1, 1, 1]} : vector<2x8x16xf32> to vector<2x8x1xf32>
    %38 = vector.extract_strided_slice %24 {offsets = [0, 0, 3], sizes = [2, 8, 1], strides = [1, 1, 1]} : vector<2x8x16xf32> to vector<2x8x1xf32>
    %39 = vector.extract_strided_slice %24 {offsets = [0, 0, 5], sizes = [2, 8, 1], strides = [1, 1, 1]} : vector<2x8x16xf32> to vector<2x8x1xf32>
    %40 = vector.extract_strided_slice %24 {offsets = [0, 0, 7], sizes = [2, 8, 1], strides = [1, 1, 1]} : vector<2x8x16xf32> to vector<2x8x1xf32>
    %41 = vector.extract_strided_slice %24 {offsets = [0, 0, 9], sizes = [2, 8, 1], strides = [1, 1, 1]} : vector<2x8x16xf32> to vector<2x8x1xf32>
    %42 = vector.extract_strided_slice %24 {offsets = [0, 0, 11], sizes = [2, 8, 1], strides = [1, 1, 1]} : vector<2x8x16xf32> to vector<2x8x1xf32>
    %43 = vector.extract_strided_slice %24 {offsets = [0, 0, 13], sizes = [2, 8, 1], strides = [1, 1, 1]} : vector<2x8x16xf32> to vector<2x8x1xf32>
    %44 = vector.extract_strided_slice %24 {offsets = [0, 0, 15], sizes = [2, 8, 1], strides = [1, 1, 1]} : vector<2x8x16xf32> to vector<2x8x1xf32>
    %45 = tpu.concatenate %37, %38, %39, %40, %41, %42, %43, %44 in 2 : vector<2x8x1xf32>, vector<2x8x1xf32>, vector<2x8x1xf32>, vector<2x8x1xf32>, vector<2x8x1xf32>, vector<2x8x1xf32>, vector<2x8x1xf32>, vector<2x8x1xf32> -> vector<2x8x8xf32>
    %c0_20 = arith.constant 0 : index
    %c1 = arith.constant 1 : index
    %c0_21 = arith.constant 0 : index
    %c0_22 = arith.constant 0 : index
    %46 = vector.load %arg2[%c0_20, %c1, %c0_21, %c0_22] : memref<2x4x8x8xf32, #tpu.memory_space<vmem>>, vector<2x1x8x8xf32>
    %47 = vector.shape_cast %46 : vector<2x1x8x8xf32> to vector<2x8x8xf32>
    %48 = vector.shape_cast %45 : vector<2x8x8xf32> to vector<2x1x8x8xf32>
    tpu.vector_store %arg2[%c0_20, %c1, %c0_21, %c0_22], %48 {strides = array<i32>} : memref<2x4x8x8xf32, #tpu.memory_space<vmem>>, vector<2x1x8x8xf32>,
    %c0_23 = arith.constant 0 : index
    %c1_24 = arith.constant 1 : index
    %c0_25 = arith.constant 0 : index
    %49 = vector.load %arg1[%c0_23, %c1_24, %c0_25] : memref<2x16x16xf32, #tpu.memory_space<vmem>>, vector<2x1x16xf32>
    %50 = vector.shape_cast %49 : vector<2x1x16xf32> to vector<2x16xf32>
    %c0_26 = arith.constant 0 : index
    %c3 = arith.constant 3 : index
    %c0_27 = arith.constant 0 : index
    %51 = vector.load %arg1[%c0_26, %c3, %c0_27] : memref<2x16x16xf32, #tpu.memory_space<vmem>>, vector<2x1x16xf32>
    %52 = vector.shape_cast %51 : vector<2x1x16xf32> to vector<2x16xf32>
    %c0_28 = arith.constant 0 : index
    %c5 = arith.constant 5 : index
    %c0_29 = arith.constant 0 : index
    %53 = vector.load %arg1[%c0_28, %c5, %c0_29] : memref<2x16x16xf32, #tpu.memory_space<vmem>>, vector<2x1x16xf32>
    %54 = vector.shape_cast %53 : vector<2x1x16xf32> to vector<2x16xf32>
    %c0_30 = arith.constant 0 : index
    %c7 = arith.constant 7 : index
    %c0_31 = arith.constant 0 : index
    %55 = vector.load %arg1[%c0_30, %c7, %c0_31] : memref<2x16x16xf32, #tpu.memory_space<vmem>>, vector<2x1x16xf32>
    %56 = vector.shape_cast %55 : vector<2x1x16xf32> to vector<2x16xf32>
    %c0_32 = arith.constant 0 : index
    %c9 = arith.constant 9 : index
    %c0_33 = arith.constant 0 : index
    %57 = vector.load %arg1[%c0_32, %c9, %c0_33] : memref<2x16x16xf32, #tpu.memory_space<vmem>>, vector<2x1x16xf32>
    %58 = vector.shape_cast %57 : vector<2x1x16xf32> to vector<2x16xf32>
    %c0_34 = arith.constant 0 : index
    %c11 = arith.constant 11 : index
    %c0_35 = arith.constant 0 : index
    %59 = vector.load %arg1[%c0_34, %c11, %c0_35] : memref<2x16x16xf32, #tpu.memory_space<vmem>>, vector<2x1x16xf32>
    %60 = vector.shape_cast %59 : vector<2x1x16xf32> to vector<2x16xf32>
    %c0_36 = arith.constant 0 : index
    %c13 = arith.constant 13 : index
    %c0_37 = arith.constant 0 : index
    %61 = vector.load %arg1[%c0_36, %c13, %c0_37] : memref<2x16x16xf32, #tpu.memory_space<vmem>>, vector<2x1x16xf32>
    %62 = vector.shape_cast %61 : vector<2x1x16xf32> to vector<2x16xf32>
    %c0_38 = arith.constant 0 : index
    %c15 = arith.constant 15 : index
    %c0_39 = arith.constant 0 : index
    %63 = vector.load %arg1[%c0_38, %c15, %c0_39] : memref<2x16x16xf32, #tpu.memory_space<vmem>>, vector<2x1x16xf32>
    %64 = vector.shape_cast %63 : vector<2x1x16xf32> to vector<2x16xf32>
    %65 = vector.shape_cast %50 : vector<2x16xf32> to vector<2x1x16xf32>
    %66 = vector.shape_cast %52 : vector<2x16xf32> to vector<2x1x16xf32>
    %67 = vector.shape_cast %54 : vector<2x16xf32> to vector<2x1x16xf32>
    %68 = vector.shape_cast %56 : vector<2x16xf32> to vector<2x1x16xf32>
    %69 = vector.shape_cast %58 : vector<2x16xf32> to vector<2x1x16xf32>
    %70 = vector.shape_cast %60 : vector<2x16xf32> to vector<2x1x16xf32>
    %71 = vector.shape_cast %62 : vector<2x16xf32> to vector<2x1x16xf32>
    %72 = vector.shape_cast %64 : vector<2x16xf32> to vector<2x1x16xf32>
    %73 = tpu.concatenate %65, %66, %67, %68, %69, %70, %71, %72 in 1 : vector<2x1x16xf32>, vector<2x1x16xf32>, vector<2x1x16xf32>, vector<2x1x16xf32>, vector<2x1x16xf32>, vector<2x1x16xf32>, vector<2x1x16xf32>, vector<2x1x16xf32> -> vector<2x8x16xf32>
    %74 = vector.extract_strided_slice %73 {offsets = [0, 0, 0], sizes = [2, 8, 1], strides = [1, 1, 1]} : vector<2x8x16xf32> to vector<2x8x1xf32>
    %75 = vector.extract_strided_slice %73 {offsets = [0, 0, 2], sizes = [2, 8, 1], strides = [1, 1, 1]} : vector<2x8x16xf32> to vector<2x8x1xf32>
    %76 = vector.extract_strided_slice %73 {offsets = [0, 0, 4], sizes = [2, 8, 1], strides = [1, 1, 1]} : vector<2x8x16xf32> to vector<2x8x1xf32>
    %77 = vector.extract_strided_slice %73 {offsets = [0, 0, 6], sizes = [2, 8, 1], strides = [1, 1, 1]} : vector<2x8x16xf32> to vector<2x8x1xf32>
    %78 = vector.extract_strided_slice %73 {offsets = [0, 0, 8], sizes = [2, 8, 1], strides = [1, 1, 1]} : vector<2x8x16xf32> to vector<2x8x1xf32>
    %79 = vector.extract_strided_slice %73 {offsets = [0, 0, 10], sizes = [2, 8, 1], strides = [1, 1, 1]} : vector<2x8x16xf32> to vector<2x8x1xf32>
    %80 = vector.extract_strided_slice %73 {offsets = [0, 0, 12], sizes = [2, 8, 1], strides = [1, 1, 1]} : vector<2x8x16xf32> to vector<2x8x1xf32>
    %81 = vector.extract_strided_slice %73 {offsets = [0, 0, 14], sizes = [2, 8, 1], strides = [1, 1, 1]} : vector<2x8x16xf32> to vector<2x8x1xf32>
    %82 = tpu.concatenate %74, %75, %76, %77, %78, %79, %80, %81 in 2 : vector<2x8x1xf32>, vector<2x8x1xf32>, vector<2x8x1xf32>, vector<2x8x1xf32>, vector<2x8x1xf32>, vector<2x8x1xf32>, vector<2x8x1xf32>, vector<2x8x1xf32> -> vector<2x8x8xf32>
    %c0_40 = arith.constant 0 : index
    %c2_41 = arith.constant 2 : index
    %c0_42 = arith.constant 0 : index
    %c0_43 = arith.constant 0 : index
    %83 = vector.load %arg2[%c0_40, %c2_41, %c0_42, %c0_43] : memref<2x4x8x8xf32, #tpu.memory_space<vmem>>, vector<2x1x8x8xf32>
    %84 = vector.shape_cast %83 : vector<2x1x8x8xf32> to vector<2x8x8xf32>
    %85 = vector.shape_cast %82 : vector<2x8x8xf32> to vector<2x1x8x8xf32>
    tpu.vector_store %arg2[%c0_40, %c2_41, %c0_42, %c0_43], %85 {strides = array<i32>} : memref<2x4x8x8xf32, #tpu.memory_space<vmem>>, vector<2x1x8x8xf32>,
    %86 = vector.extract_strided_slice %73 {offsets = [0, 0, 1], sizes = [2, 8, 1], strides = [1, 1, 1]} : vector<2x8x16xf32> to vector<2x8x1xf32>
    %87 = vector.extract_strided_slice %73 {offsets = [0, 0, 3], sizes = [2, 8, 1], strides = [1, 1, 1]} : vector<2x8x16xf32> to vector<2x8x1xf32>
    %88 = vector.extract_strided_slice %73 {offsets = [0, 0, 5], sizes = [2, 8, 1], strides = [1, 1, 1]} : vector<2x8x16xf32> to vector<2x8x1xf32>
    %89 = vector.extract_strided_slice %73 {offsets = [0, 0, 7], sizes = [2, 8, 1], strides = [1, 1, 1]} : vector<2x8x16xf32> to vector<2x8x1xf32>
    %90 = vector.extract_strided_slice %73 {offsets = [0, 0, 9], sizes = [2, 8, 1], strides = [1, 1, 1]} : vector<2x8x16xf32> to vector<2x8x1xf32>
    %91 = vector.extract_strided_slice %73 {offsets = [0, 0, 11], sizes = [2, 8, 1], strides = [1, 1, 1]} : vector<2x8x16xf32> to vector<2x8x1xf32>
    %92 = vector.extract_strided_slice %73 {offsets = [0, 0, 13], sizes = [2, 8, 1], strides = [1, 1, 1]} : vector<2x8x16xf32> to vector<2x8x1xf32>
    %93 = vector.extract_strided_slice %73 {offsets = [0, 0, 15], sizes = [2, 8, 1], strides = [1, 1, 1]} : vector<2x8x16xf32> to vector<2x8x1xf32>
    %94 = tpu.concatenate %86, %87, %88, %89, %90, %91, %92, %93 in 2 : vector<2x8x1xf32>, vector<2x8x1xf32>, vector<2x8x1xf32>, vector<2x8x1xf32>, vector<2x8x1xf32>, vector<2x8x1xf32>, vector<2x8x1xf32>, vector<2x8x1xf32> -> vector<2x8x8xf32>
    %c0_44 = arith.constant 0 : index
    %c3_45 = arith.constant 3 : index
    %c0_46 = arith.constant 0 : index
    %c0_47 = arith.constant 0 : index
    %95 = vector.load %arg2[%c0_44, %c3_45, %c0_46, %c0_47] : memref<2x4x8x8xf32, #tpu.memory_space<vmem>>, vector<2x1x8x8xf32>
    %96 = vector.shape_cast %95 : vector<2x1x8x8xf32> to vector<2x8x8xf32>
    %97 = vector.shape_cast %94 : vector<2x8x8xf32> to vector<2x1x8x8xf32>
    tpu.vector_store %arg2[%c0_44, %c3_45, %c0_46, %c0_47], %97 {strides = array<i32>} : memref<2x4x8x8xf32, #tpu.memory_space<vmem>>, vector<2x1x8x8xf32>,
    return
  }
  func.func @transform_0(%arg0: i32) -> (i32, i32, i32) {
    %c0_i32 = arith.constant 0 : i32
    %c0_i32_0 = arith.constant 0 : i32
    %c0_i32_1 = arith.constant 0 : i32
    return %arg0, %c0_i32, %c0_i32_0 : i32, i32, i32
  }
  func.func @transform_1(%arg0: i32) -> (i32, i32, i32, i32) {
    %c0_i32 = arith.constant 0 : i32
    %c0_i32_0 = arith.constant 0 : i32
    %c0_i32_1 = arith.constant 0 : i32
    %c0_i32_2 = arith.constant 0 : i32
    return %arg0, %c0_i32, %c0_i32_0, %c0_i32_1 : i32, i32, i32, i32
  }
}

</mosaic_0001>

<bundles_post_ra>
// kernel: tpu_custom_call.1
= control target key start
LH: loop header
LB: loop body
LE: loop exit
PB: predicated region body
PF: predicated region fallthrough
CT: control target
= control target key end

     0   :  { %6 = vsyncpa [#allocation3], 0  ;;  %s1172_s0 = inlined_call_operand.hbm [shape: f32[8,16,16], index: 0, kind: input, shape index: {}]   ;;  %s1173_s1 = inlined_call_operand.hbm [shape: f32[8,4,8,8], index: 1, kind: output, shape index: {}]  }
   0x1   :  { %8 = vsyncpa [#allocation3 + $0x1], 0 }
   0x2   :  { %9 = vsyncpa [#allocation4], 0 }
   0x3   :  { %11 = vsyncpa [#allocation4 + $0x1], 0  ;;  %s758_s6 = smov 0   ;;  %s760_s7 = smov 0  }
   0x4   :  { %s762_s8 = smov 0   ;;  %s764_s9 = smov 0  }
   0x5 LB: > { %s779_s10 = sadd.s32 4294967295, %s732_s9   ;;  %s552_s11 = sadd.s32 4294967294, %s732_s9   ;;  %s732_s9 = sphi %s764_s9, %s1185_s9   ;;  %s728_s8 = sphi %s762_s8, %s1184_s8   ;;  %s724_s7 = sphi %s760_s7, %s1183_s7   ;;  %s720_s6 = sphi %s758_s6, %s1182_s6  }
   0x6   : > { %s783_s12 = sadd.s32 1, %s732_s9   ;;  %s24_s13 = sadd.s32 1, %s728_s8 }
   0x7   : > { %s21_s14 = ssub.s32 %s732_s9, %s783_s12  ;;  %p31_p0 = scmp.ne.s32.totalorder %s728_s8, %s724_s7 }
   0x8   : > { %p22_p1 = scmp.eq.s32.totalorder %s21_s14, 0  ;;  %p32_p2 = scmp.eq.s32.totalorder %s732_s9, 0 }
   0x9   : > { %p37_p3 = scmp.ne.s32.totalorder %s724_s7, %s720_s6  ;;  %p38_p4 = scmp.eq.s32.totalorder %s779_s10, 0 }
   0xa   : > { %s795_s15 = scalar_select %p22_p1, %s728_s8, %s24_s13  }
   0xb   : > { %p797_p5 = por %p32_p2, %p31_p0  ;;  %p801_p6 = por %p38_p4, %p37_p3 }
   0xc   : > { %p61_p7 = scmp.eq.s32.totalorder %s779_s10, 3  ;;  %p67_p8 = scmp.eq.s32.totalorder %s552_s11, 3 }
   0xd   : > { %p590_p9 = scmp.lt.s32.totalorder %s732_s9, 4  ;;  %s87_s20 = sand.u32 1, %s728_s8  }
   0xe   : > { %p807_p10 = por %p61_p7, %p31_p0  ;;  %p811_p11 = por %p67_p8, %p37_p3 }
   0xf   : > { %s575_s21 = sshll.u32 %s732_s9, 9  ;;  %s555_s22 = sshll.u32 %s87_s20, 5 }
  0x10   : > { %s1177_s18 = scalar_select %p807_p10, 1, 0 }
  0x11   : > { %s1178_s19 = scalar_select %p811_p11, 1, 0 }
  0x12   : > { %s820_s25 = scalar_lea.hbm %s1172_s0, %s575_s21  ;;  %s91_s26 = scalar_lea.vmem [#allocation2], %s555_s22 }
  0x13   : > { %s99_s27 = sshll.u32 %s91_s26, 4  ;;  %p824_p12 = pnand %p590_p9, %p797_p5  ;;  %s828_s27 = int_to_ptr.vmem [resolvable:$true] %s99_s27 }
  0x14   : > { %s830_s29 = scalar_lea.sflag [#allocation3], %s87_s20  ;;  %s636_s30 = scalar_lea.hbm %s820_s25, 512 }
  0x15   : > { %p637_p13 = scmp.ne.s32.totalorder %s820_s25, %s636_s30  ;;  %p638_p0 = pneg %p824_p12 }
  0x16   : > { %s641_s4 = scalar_lea.hbm %s1172_s0, 2048  ;;  %p642_p3 = scmp.lt.u32.totalorder %s820_s25, %s1172_s0 }
  0x17   : > { %p639_p1 = pnand %p638_p0, %p637_p13  ;;  %p643_p4 = scmp.lt.u32.totalorder %s641_s4, %s636_s30 }
  0x18   : > { %p645_p7 = scmp.lt.u32.totalorder %s636_s30, %s820_s25 }
  0x19   : > { %p640_p2 = pneg %p639_p1  ;;  %p644_p5 = por %p643_p4, %p642_p3 }
  0x1b   : > { %p646_p8 = por %p645_p7, %p644_p5 }
  0x1d   : > { %p647_p9 = pnand %p646_p8, %p640_p2 }
  0x1f   : > { %650 = shalt.err (!%p647_p9)
}
  0x20   : > { %s651_s13 = scalar_lea.vmem %s828_s27, 512  ;;  %s734_s14 = smov [#allocation2]  }
  0x21   : > { %p652_p13 = scmp.ne.s32.totalorder %s828_s27, %s651_s13  ;;  %s656_s16 = sshll.u32 %s734_s14, 4  ;;  %s657_s16 = int_to_ptr.vmem [resolvable:$false] %s656_s16 }
  0x22   : > { %s658_s20 = scalar_lea.vmem %s657_s16, 1024  ;;  %p659_p10 = scmp.lt.s32.totalorder %s828_s27, %s657_s16 }
  0x23   : > { %p654_p1 = pnand %p652_p13, %p638_p0  ;;  %p660_p3 = scmp.lt.s32.totalorder %s658_s20, %s651_s13 }
  0x25   : > { %p655_p11 = pneg %p654_p1  ;;  %p661_p4 = por %p660_p3, %p659_p10 }
  0x27   : > { %p662_p5 = pnand %p661_p4, %p655_p11 }
  0x29   : > { %665 = shalt.err (!%p662_p5)
}
  0x2a   : > { %s735_s21 = smov 128   ;;  %s736_s22 = smov 8  }
  0x2b   : > { %585 = dma.hbm_to_vmem [thread:$0]  (!%p824_p12), %s820_s25, 512, %s828_s27, %s830_s29, %s735_s21, %s735_s21, %s736_s22  }
  0x2c   : > { %p559_p0 = scmp.ge.s32.totalorder %s732_s9, 1  ;;  %p107_p2 = scmp.lt.s32.totalorder %s732_s9, 5 }
  0x2e   : > { %p108_p7 = pnand %p559_p0, %p107_p2 }
  0x2f   : > { %s861_s23 = sand.u32 (!%p108_p7), 1, %s724_s7  }
  0x30   : > { %111 = sbr.rel (%p108_p7) target bundleno = 263 (0x107), region = 24  ;;  %s560_s24 = sshll.u32 (!%p108_p7), %s861_s23, 5 }
  0x31   : > { %s114_s26 = scalar_lea.sflag (!%p108_p7), [#allocation3], %s861_s23  ;;  %s865_s30 = scalar_lea.vmem (!%p108_p7), [#allocation2], %s560_s24 }
  0x37   : > { %711 = dma.done.wait (%p801_p6), %s114_s26, 512  }
  0x38   : > { %713 = vsyncadd (%p801_p6), %s114_s26, 4294966784  ;;  %vm196_vm0 = vcmask 1040384   ;;  %vm199_vm1 = vcmask 1041408   ;;  %vm202_vm2 = vcmask 1042432   ;;  %vm205_vm3 = vcmask 1043456   ;;  %s737_s17 = smov 126  }
  0x39   : > { %vm208_vm4 = vcmask 1044480   ;;  %vm211_vm5 = vcmask 1045504   ;;  %v138_v0 = vld [vmem:[%s865_s30] sm:$0x1]  ;;  %v140_v1 = vld [vmem:[%s865_s30 + $0x2] sm:$0x1] }
  0x3a   : > { %v142_v2 = vld [vmem:[%s865_s30 + $0x4] sm:$0x1]  ;;  %v144_v3 = vld [vmem:[%s865_s30 + $0x6] sm:$0x1]  ;;  %v146_v4 = vld [vmem:[%s865_s30 + $0x8] sm:$0x1] }
  0x3b   : > { %v148_v5 = vld [vmem:[%s865_s30 + $0xa] sm:$0x1]  ;;  %v150_v6 = vld [vmem:[%s865_s30 + $0xc] sm:$0x1]  ;;  %v152_v7 = vld [vmem:[%s865_s30 + $0xe] sm:$0x1] }
  0x3c   : > { %v156_v8 = vrot.slane %v140_v1, 7  ;;  %v162_v9 = vrot.slane %v142_v2, 6  ;;  %v168_v10 = vrot.slane %v144_v3, 5  ;;  %v174_v11 = vrot.slane %v146_v4, 4  ;;  %v139_v13 = vld [vmem:[%s865_s30 + $0x10] sm:$0x1] }
  0x3d   : > { %v180_v12 = vrot.slane %v148_v5, 3  ;;  %vm214_vm6 = vcmask 1046528   ;;  %v186_v14 = vrot.slane %v150_v6, 2  ;;  %v192_v15 = vrot.slane %v152_v7, 1  ;;  %v141_v17 = vld [vmem:[%s865_s30 + $0x12] sm:$0x1] }
  0x3e   : > { %v197_v16 = vsel %vm196_vm0, %v138_v0, %v156_v8  ;;  %v143_v18 = vld [vmem:[%s865_s30 + $0x14] sm:$0x1]  ;;  %v145_v20 = vld [vmem:[%s865_s30 + $0x16] sm:$0x1]  ;;  %v147_v21 = vld [vmem:[%s865_s30 + $0x18] sm:$0x1] }
  0x3f   : > { %v200_v19 = vsel %vm199_vm1, %v197_v16, %v162_v9  ;;  %v149_v22 = vld [vmem:[%s865_s30 + $0x1a] sm:$0x1]  ;;  %v151_v24 = vld [vmem:[%s865_s30 + $0x1c] sm:$0x1]  ;;  %v153_v25 = vld [vmem:[%s865_s30 + $0x1e] sm:$0x1] }
  0x40   : > { %v203_v23 = vsel %vm202_vm2, %v200_v19, %v168_v10  ;;  %v157_v26 = vrot.slane %v141_v17, 7  ;;  %v163_v27 = vrot.slane %v143_v18, 6  ;;  %v169_v29 = vrot.slane %v145_v20, 5  ;;  %v309_v32 = vld [vmem:[%s865_s30 + $0x11] sm:$0x1]  ;;  %s738_s25 = smov 127  }
  0x41   : > { %v206_v28 = vsel %vm205_vm3, %v203_v23, %v174_v11  ;;  %v175_v30 = vrot.slane %v147_v21, 4  ;;  %v181_v31 = vrot.slane %v149_v22, 3  ;;  %v187_v34 = vrot.slane %v151_v24, 2  ;;  %v311_v37 = vld [vmem:[%s865_s30 + $0x13] sm:$0x1]  ;;  %s739_s27 = smov 125  }
  0x42   : > { %v209_v33 = vsel %vm208_vm4, %v206_v28, %v180_v12  ;;  %v193_v35 = vrot.slane %v153_v25, 1  ;;  %v198_v36 = vsel %vm196_vm0, %v139_v13, %v157_v26  ;;  %v313_v38 = vld [vmem:[%s865_s30 + $0x15] sm:$0x1]  ;;  %v315_v41 = vld [vmem:[%s865_s30 + $0x17] sm:$0x1]  ;;  %v327_v48 = vrot.slane %v311_v37, 7 }
  0x43   : > { %v212_v39 = vsel %vm211_vm5, %v209_v33, %v186_v14  ;;  %v201_v40 = vsel %vm199_vm1, %v198_v36, %v163_v27  ;;  %v317_v42 = vld [vmem:[%s865_s30 + $0x19] sm:$0x1]  ;;  %v319_v43 = vld [vmem:[%s865_s30 + $0x1b] sm:$0x1]  ;;  %v321_v46 = vld [vmem:[%s865_s30 + $0x1d] sm:$0x1] }
  0x44   : > { %v902_v44 = vsel %vm214_vm6, %v212_v39, %v192_v15  ;;  %v204_v45 = vsel %vm202_vm2, %v201_v40, %v169_v29  ;;  %v323_v47 = vld [vmem:[%s865_s30 + $0x1f] sm:$0x1]  ;;  %v333_v49 = vrot.slane %v313_v38, 6  ;;  %v339_v51 = vrot.slane %v315_v41, 5  ;;  %v308_v54 = vld [vmem:[%s865_s30 + $0x1] sm:$0x1] }
  0x45   : > { %225 = vrot.lane.b32.xlu1 %v902_v44, %s737_s17  ;;  %219 = vrot.lane.b32.xlu0 %v902_v44, %s738_s25  ;;  %v207_v50 = vsel %vm205_vm3, %v204_v45, %v175_v30  ;;  %v345_v52 = vrot.slane %v317_v42, 4  ;;  %v351_v53 = vrot.slane %v319_v43, 3  ;;  %v357_v56 = vrot.slane %v321_v46, 2  ;;  %v310_v59 = vld [vmem:[%s865_s30 + $0x3] sm:$0x1]  ;;  %s740_s28 = smov 124  }
  0x46   : > { %v210_v55 = vsel %vm208_vm4, %v207_v50, %v181_v31  ;;  %v363_v57 = vrot.slane %v323_v47, 1  ;;  %v367_v58 = vsel %vm196_vm0, %v309_v32, %v327_v48  ;;  %v312_v60 = vld [vmem:[%s865_s30 + $0x5] sm:$0x1]  ;;  %v314_v63 = vld [vmem:[%s865_s30 + $0x7] sm:$0x1]  ;;  %v326_v5 = vrot.slane %v310_v59, 7 }
  0x47   : > { %v213_v61 = vsel %vm211_vm5, %v210_v55, %v187_v34  ;;  %v369_v62 = vsel %vm199_vm1, %v367_v58, %v333_v49  ;;  %v316_v0 = vld [vmem:[%s865_s30 + $0x9] sm:$0x1]  ;;  %v318_v1 = vld [vmem:[%s865_s30 + $0xb] sm:$0x1]  ;;  %v320_v4 = vld [vmem:[%s865_s30 + $0xd] sm:$0x1] }
  0x48   : > { %v923_v2 = vsel %vm214_vm6, %v213_v61, %v193_v35  ;;  %v371_v3 = vsel %vm202_vm2, %v369_v62, %v339_v51  ;;  %v332_v6 = vrot.slane %v312_v60, 6  ;;  %v322_v8 = vld [vmem:[%s865_s30 + $0xf] sm:$0x1]  ;;  %v338_v9 = vrot.slane %v314_v63, 5  ;;  %s741_s29 = smov 123   ;;  %s742_s2 = smov 122  }
  0x49   : > { %227 = vrot.lane.b32.xlu1 %v923_v2, %s737_s17  ;;  %221 = vrot.lane.b32.xlu0 %v923_v2, %s738_s25  ;;  %v373_v7 = vsel %vm205_vm3, %v371_v3, %v345_v52  ;;  %v344_v10 = vrot.slane %v316_v0, 4  ;;  %v350_v12 = vrot.slane %v318_v1, 3  ;;  %v366_v13 = vsel %vm196_vm0, %v308_v54, %v326_v5  ;;  %s743_s3 = smov 121   ;;  %s744_s4 = smov 120  }
  0x4a   : > { %v375_v11 = vsel %vm208_vm4, %v373_v7, %v351_v53  ;;  %v356_v15 = vrot.slane %v320_v4, 2  ;;  %v368_v16 = vsel %vm199_vm1, %v366_v13, %v332_v6  ;;  %v362_v18 = vrot.slane %v322_v8, 1  ;;  %s561_s5 = sshll.u32 %s861_s23, 6  ;;  %s577_s14 = sshll.u32 %s779_s10, 10 }
  0x4b   : > { %v377_v14 = vsel %vm211_vm5, %v375_v11, %v357_v56  ;;  %v370_v19 = vsel %vm202_vm2, %v368_v16, %v338_v9  ;;  %vm261_vm7 = vcmask 7168   ;;  %vm267_vm8 = vcmask 23552   ;;  %s1038_s11 = scalar_lea.vmem [#allocation5], %s561_s5  ;;  %s1125_s20 = scalar_lea.hbm %s1173_s1, %s577_s14 }
  0x4c   : > { %v938_v17 = vsel %vm214_vm6, %v377_v14, %v363_v57  ;;  %v372_v20 = vsel %vm205_vm3, %v370_v19, %v344_v10  ;;  %vm264_vm9 = vcmask 15360   ;;  %vm270_vm10 = vcmask 31744   ;;  %s479_s13 = sshll.u32 %s1038_s11, 4  ;;  %s465_s21 = scalar_lea.sflag [#allocation4], %s861_s23  ;;  %s1114_s13 = int_to_ptr.vmem [resolvable:$true] %s479_s13 }
  0x4d   : > { %384 = vrot.lane.b32.xlu1 %v938_v17, %s738_s25  ;;  %v374_v21 = vsel %vm208_vm4, %v372_v20, %v350_v12  ;;  %vm273_vm11 = vcmask 39936   ;;  %vm276_vm12 = vcmask 48128   ;;  %vm279_vm13 = vcmask 56320   ;;  %s666_s22 = scalar_lea.vmem %s1114_s13, 1024  ;;  %p1180_p10 = scmp.ne.s32.totalorder %s1177_s18, 0 }
  0x4e   : > { %v376_v22 = vsel %vm211_vm5, %v374_v21, %v356_v15  ;;  %vm282_vm14 = vcmask 64512   ;;  %p667_p6 = scmp.ne.s32.totalorder %s1114_s13, %s666_s22  ;;  %s745_s24 = smov [#allocation5]  }
  0x4f   : > { %v947_v23 = vsel %vm214_vm6, %v376_v22, %v362_v18  ;;  %s670_s26 = sshll.u32 %s745_s24, 4  ;;  %s671_s26 = int_to_ptr.vmem [resolvable:$false] %s670_s26 }
  0x50   : > { %382 = vrot.lane.b32.xlu0 %v947_v23, %s738_s25  ;;  %p668_p11 = pnand %p667_p6, %p1180_p10  ;;  %s672_s30 = scalar_lea.vmem %s671_s26, 2048 }
  0x51   : > { %390 = vrot.lane.b32.xlu1 %v938_v17, %s737_s17  ;;  %p673_p8 = scmp.lt.s32.totalorder %s1114_s13, %s671_s26  ;;  %p674_p9 = scmp.lt.s32.totalorder %s672_s30, %s666_s22 }
  0x52   : > { %p669_p12 = pneg %p668_p11 }
  0x53   : > { %p675_p13 = por %p674_p9, %p673_p8 }
  0x54   : > { %388 = vrot.lane.b32.xlu0 %v947_v23, %s737_s17 }
  0x55   : > { %233 = vrot.lane.b32.xlu1 %v923_v2, %s739_s27  ;;  %p676_p1 = pnand %p675_p13, %p669_p12 }
  0x58   : > { %231 = vrot.lane.b32.xlu0 %v902_v44, %s739_s27 }
  0x59   : > { %396 = vrot.lane.b32.xlu1 %v938_v17, %s739_s27 }
  0x5c   : > { %394 = vrot.lane.b32.xlu0 %v947_v23, %s739_s27 }
  0x5d   : > { %239 = vrot.lane.b32.xlu1 %v923_v2, %s740_s28 }
  0x60   : > { %237 = vrot.lane.b32.xlu0 %v902_v44, %s740_s28 }
  0x61   : > { %402 = vrot.lane.b32.xlu1 %v938_v17, %s740_s28 }
  0x64   : > { %400 = vrot.lane.b32.xlu0 %v947_v23, %s740_s28 }
  0x65   : > { %245 = vrot.lane.b32.xlu1 %v923_v2, %s741_s29 }
  0x68   : > { %243 = vrot.lane.b32.xlu0 %v902_v44, %s741_s29 }
  0x69   : > { %408 = vrot.lane.b32.xlu1 %v938_v17, %s741_s29 }
  0x6c   : > { %406 = vrot.lane.b32.xlu0 %v947_v23, %s741_s29 }
  0x6d   : > { %251 = vrot.lane.b32.xlu1 %v923_v2, %s742_s2 }
  0x70   : > { %249 = vrot.lane.b32.xlu0 %v902_v44, %s742_s2 }
  0x71   : > { %414 = vrot.lane.b32.xlu1 %v938_v17, %s742_s2 }
  0x74   : > { %412 = vrot.lane.b32.xlu0 %v947_v23, %s742_s2 }
  0x75   : > { %257 = vrot.lane.b32.xlu1 %v923_v2, %s743_s3 }
  0x78   : > { %255 = vrot.lane.b32.xlu0 %v902_v44, %s743_s3 }
  0x79   : > { %420 = vrot.lane.b32.xlu1 %v938_v17, %s743_s3 }
  0x7c   : > { %418 = vrot.lane.b32.xlu0 %v947_v23, %s743_s3 }
  0x7d   : > { %287 = vrot.lane.b32.xlu1 %v923_v2, %s744_s4 }
  0x80   : > { %285 = vrot.lane.b32.xlu0 %v902_v44, %s744_s4 }
  0x81   : > { %443 = vrot.lane.b32.xlu1 %v938_v17, %s744_s4 }
  0x84   : > { %441 = vrot.lane.b32.xlu0 %v947_v23, %s744_s4 }
  0xb7   : > { %v979_v24 = vpop.permute.xlu1 %225  ;;  %v981_v25 = vpop.permute.xlu0 %219 }
  0xb8   : > { %v262_v50 = vsel %vm261_vm7, %v902_v44, %v981_v25  ;;  %v291_v16 = vsel %vm261_vm7, %v981_v25, %v979_v24 }
  0xb9   : > { %v265_v56 = vsel %vm264_vm9, %v262_v50, %v979_v24 }
  0xbb   : > { %v228_v26 = vpop.permute.xlu1 %227  ;;  %v222_v27 = vpop.permute.xlu0 %221 }
  0xbc   : > { %v263_v46 = vsel %vm261_vm7, %v923_v2, %v222_v27  ;;  %v292_v0 = vsel %vm261_vm7, %v222_v27, %v228_v26 }
  0xbd   : > { %v266_v47 = vsel %vm264_vm9, %v263_v46, %v228_v26 }
  0xbf   : > { %v983_v28 = vpop.permute.xlu1 %384 }
  0xc0   : > { %v425_v53 = vsel %vm261_vm7, %v938_v17, %v983_v28 }
  0xc2   : > { %v985_v29 = vpop.permute.xlu0 %382 }
  0xc3   : > { %v987_v30 = vpop.permute.xlu1 %390  ;;  %v424_v1 = vsel %vm261_vm7, %v947_v23, %v985_v29 }
  0xc4   : > { %v427_v55 = vsel %vm264_vm9, %v425_v53, %v987_v30  ;;  %v448_v17 = vsel %vm261_vm7, %v983_v28, %v987_v30 }
  0xc6   : > { %v989_v31 = vpop.permute.xlu0 %388 }
  0xc7   : > { %v234_v32 = vpop.permute.xlu1 %233  ;;  %v426_v4 = vsel %vm264_vm9, %v424_v1, %v989_v31 }
  0xc8   : > { %v269_v51 = vsel %vm267_vm8, %v266_v47, %v234_v32  ;;  %v294_v5 = vsel %vm264_vm9, %v292_v0, %v234_v32 }
  0xca   : > { %v991_v33 = vpop.permute.xlu0 %231 }
  0xcb   : > { %v993_v34 = vpop.permute.xlu1 %396  ;;  %v268_v59 = vsel %vm267_vm8, %v265_v56, %v991_v33  ;;  %v293_v20 = vsel %vm264_vm9, %v291_v16, %v991_v33 }
  0xcc   : > { %v429_v60 = vsel %vm267_vm8, %v427_v55, %v993_v34  ;;  %v450_v21 = vsel %vm264_vm9, %v448_v17, %v993_v34  ;;  %v447_v34 = vsel %vm261_vm7, %v985_v29, %v989_v31 }
  0xce   : > { %v995_v35 = vpop.permute.xlu0 %394 }
  0xcf   : > { %v240_v36 = vpop.permute.xlu1 %239  ;;  %v428_v10 = vsel %vm267_vm8, %v426_v4, %v995_v35 }
  0xd0   : > { %v272_v52 = vsel %vm270_vm10, %v269_v51, %v240_v36  ;;  %v296_v11 = vsel %vm267_vm8, %v294_v5, %v240_v36 }
  0xd2   : > { %v997_v37 = vpop.permute.xlu0 %237 }
  0xd3   : > { %v999_v38 = vpop.permute.xlu1 %402  ;;  %v271_v62 = vsel %vm270_vm10, %v268_v59, %v997_v37  ;;  %v295_v26 = vsel %vm267_vm8, %v293_v20, %v997_v37 }
  0xd4   : > { %v431_v63 = vsel %vm270_vm10, %v429_v60, %v999_v38  ;;  %v452_v27 = vsel %vm267_vm8, %v450_v21, %v999_v38  ;;  %v449_v38 = vsel %vm264_vm9, %v447_v34, %v995_v35 }
  0xd6   : > { %v1001_v39 = vpop.permute.xlu0 %400 }
  0xd7   : > { %v246_v40 = vpop.permute.xlu1 %245  ;;  %v430_v14 = vsel %vm270_vm10, %v428_v10, %v1001_v39  ;;  %v451_v29 = vsel %vm267_vm8, %v449_v38, %v1001_v39 }
  0xd8   : > { %v275_v54 = vsel %vm273_vm11, %v272_v52, %v246_v40  ;;  %v298_v15 = vsel %vm270_vm10, %v296_v11, %v246_v40 }
  0xda   : > { %v1003_v41 = vpop.permute.xlu0 %243 }
  0xdb   : > { %v1005_v42 = vpop.permute.xlu1 %408  ;;  %v274_v2 = vsel %vm273_vm11, %v271_v62, %v1003_v41  ;;  %v297_v32 = vsel %vm270_vm10, %v295_v26, %v1003_v41 }
  0xdc   : > { %v433_v3 = vsel %vm273_vm11, %v431_v63, %v1005_v42  ;;  %v454_v33 = vsel %vm270_vm10, %v452_v27, %v1005_v42 }
  0xde   : > { %v1007_v43 = vpop.permute.xlu0 %406 }
  0xdf   : > { %v252_v45 = vpop.permute.xlu1 %251  ;;  %v432_v18 = vsel %vm273_vm11, %v430_v14, %v1007_v43  ;;  %v453_v35 = vsel %vm270_vm10, %v451_v29, %v1007_v43 }
  0xe0   : > { %v278_v44 = vsel %vm276_vm12, %v275_v54, %v252_v45  ;;  %v300_v19 = vsel %vm273_vm11, %v298_v15, %v252_v45 }
  0xe2   : > { %v250_v48 = vpop.permute.xlu0 %249 }
  0xe3   : > { %v415_v49 = vpop.permute.xlu1 %414  ;;  %v277_v6 = vsel %vm276_vm12, %v274_v2, %v250_v48  ;;  %v299_v36 = vsel %vm273_vm11, %v297_v32, %v250_v48 }
  0xe4   : > { %v435_v7 = vsel %vm276_vm12, %v433_v3, %v415_v49  ;;  %v456_v37 = vsel %vm273_vm11, %v454_v33, %v415_v49 }
  0xe6   : > { %v1027_v57 = vpop.permute.xlu0 %412 }
  0xe7   : > { %v258_v58 = vpop.permute.xlu1 %257  ;;  %v434_v22 = vsel %vm276_vm12, %v432_v18, %v1027_v57  ;;  %v455_v39 = vsel %vm273_vm11, %v453_v35, %v1027_v57 }
  0xe8   : > { %v281_v61 = vsel %vm279_vm13, %v278_v44, %v258_v58  ;;  %v302_v23 = vsel %vm276_vm12, %v300_v19, %v258_v58 }
  0xe9   : > { %284 = vst.msk [vmem:[%s1038_s11 + $0x20] sm:$0xff] %vm282_vm14, %v281_v61 }
  0xea   : > { %v256_v8 = vpop.permute.xlu0 %255 }
  0xeb   : > { %v421_v9 = vpop.permute.xlu1 %420  ;;  %v280_v12 = vsel %vm279_vm13, %v277_v6, %v256_v8  ;;  %v301_v40 = vsel %vm276_vm12, %v299_v36, %v256_v8 }
  0xec   : > { %v437_v13 = vsel %vm279_vm13, %v435_v7, %v421_v9  ;;  %283 = vst.msk [vmem:[%s1038_s11] sm:$0xff] %vm282_vm14, %v280_v12  ;;  %v458_v41 = vsel %vm276_vm12, %v456_v37, %v421_v9 }
  0xed   : > { %565 = vst.msk [vmem:[%s1038_s11 + $0x30] sm:$0xff] %vm282_vm14, %v437_v13 }
  0xee   : > { %v419_v24 = vpop.permute.xlu0 %418 }
  0xef   : > { %v288_v25 = vpop.permute.xlu1 %287  ;;  %v436_v28 = vsel %vm279_vm13, %v434_v22, %v419_v24  ;;  %v457_v47 = vsel %vm276_vm12, %v455_v39, %v419_v24 }
  0xf0   : > { %v304_v30 = vsel %vm279_vm13, %v302_v23, %v288_v25  ;;  %564 = vst.msk [vmem:[%s1038_s11 + $0x10] sm:$0xff] %vm282_vm14, %v436_v28 }
  0xf1   : > { %563 = vst.msk [vmem:[%s1038_s11 + $0x28] sm:$0xff] %vm282_vm14, %v304_v30 }
  0xf2   : > { %v286_v42 = vpop.permute.xlu0 %285 }
  0xf3   : > { %v444_v45 = vpop.permute.xlu1 %443  ;;  %v303_v31 = vsel %vm279_vm13, %v301_v40, %v286_v42 }
  0xf4   : > { %v460_v46 = vsel %vm279_vm13, %v458_v41, %v444_v45  ;;  %562 = vst.msk [vmem:[%s1038_s11 + $0x8] sm:$0xff] %vm282_vm14, %v303_v31 }
  0xf5   : > { %567 = vst.msk [vmem:[%s1038_s11 + $0x38] sm:$0xff] %vm282_vm14, %v460_v46 }
  0xf6   : > { %v442_v43 = vpop.permute.xlu0 %441 }
  0xf7   : > { %v459_v48 = vsel %vm279_vm13, %v457_v47, %v442_v43 }
  0xf8   : > { %566 = vst.msk [vmem:[%s1038_s11 + $0x18] sm:$0xff] %vm282_vm14, %v459_v48 }
  0xf9   : > { %679 = shalt.err (!%p676_p1)
}
  0xfa   : > { %s680_s17 = scalar_lea.hbm %s1125_s20, 1024  ;;  %s684_s28 = scalar_lea.hbm %s1173_s1, 4096 }
  0xfb   : > { %p681_p3 = scmp.ne.s32.totalorder %s1125_s20, %s680_s17  ;;  %p685_p0 = scmp.lt.u32.totalorder %s1125_s20, %s1173_s1 }
  0xfc   : > { %p686_p2 = scmp.lt.u32.totalorder %s684_s28, %s680_s17  ;;  %p688_p6 = scmp.lt.u32.totalorder %s680_s17, %s1125_s20 }
  0xfd   : > { %p682_p4 = pnand %p681_p3, %p1180_p10 }
  0xfe   : > { %p687_p7 = por %p686_p2, %p685_p0 }
  0xff   : > { %p683_p5 = pneg %p682_p4 }
 0x100   : > { %p689_p11 = por %p688_p6, %p687_p7 }
 0x102   : > { %p690_p12 = pnand %p689_p11, %p683_p5 }
 0x104   : > { %693 = shalt.err (!%p690_p12)
}
 0x105   : > { %s746_s3 = smov 128   ;;  %s747_s4 = smov 8  }
 0x106   : > { %580 = dma.vmem_to_hbm [thread:$0]  (%p1180_p10), %s1114_s13, 1024, %s1125_s20, %s465_s21, %s746_s3, %s746_s3, %s747_s4  }
 0x107 PF: > { %p591_p8 = scmp.ge.s32.totalorder %s732_s9, 2  ;;  %s494_s5 = sand.u32 1, %s720_s6  }
 0x108   : > { %p1181_p9 = scmp.ne.s32.totalorder %s1178_s19, 0  ;;  %s495_s11 = scalar_lea.sflag [#allocation4], %s494_s5 }
 0x10a   : > { %p587_p13 = pnand %p591_p8, %p1181_p9 }
 0x10c   : > { %715 = dma.done.wait (!%p587_p13), %s495_s11, 1024  }
 0x10d   : > { %717 = vsyncadd (!%p587_p13), %s495_s11, 4294966272  ;;  %p14_p1 = scmp.ge.s32.totalorder %s783_s12, 6   ;;  %s1182_s6 = smov %s724_s7 }
 0x10e   : > { %s1183_s7 = smov %s728_s8  ;;  %s1184_s8 = smov %s795_s15 }
 0x10f   : > { %s1185_s9 = smov %s783_s12  ;;  %16 = sbr.rel (!%p14_p1) target bundleno = 5 (0x5), region = 72 }
 0x116   :  { %500 = vsyncpa [#allocation3], 1 }
 0x117   :  { %502 = vsyncpa [#allocation3 + $0x1], 1 }
 0x118   :  { %503 = vsyncpa [#allocation4], 1 }
 0x119   :  { %505 = vsyncpa [#allocation4 + $0x1], 1 }

</bundles_post_ra>
